<compile_context>
chip_gen: v7x
topology: tpu7x:2x2x1
jax: 0.10.0
libtpu: 0.0.40
codegen_flags: <defaults>
</compile_context>

<pallas_src>
import jax
import jax.numpy as jnp
from jax.experimental import pallas as pl
from jax.experimental.pallas import tpu as pltpu


def _round_up(x, m):
    return ((x + m - 1) // m) * m


def _make_actor_kernel(n_a, hidden, head_pad):
    def kernel(s_ref, w1_ref, w2_ref, wh_ref, b_ref, mu_ref, sigma_ref):
        # Lane-tile-aligned static slices into the packed bias row (f32).
        b1 = b_ref[:, 0:hidden]
        b2 = b_ref[:, hidden:2 * hidden]
        bh = b_ref[:, 2 * hidden:2 * hidden + head_pad]

        # bf16 operands into the MXU, f32 accumulation, f32 epilogues.
        s_bf = s_ref[...].astype(jnp.bfloat16)
        x = jnp.tanh(
            jnp.dot(s_bf, w1_ref[...], preferred_element_type=jnp.float32) + b1
        )
        x = jnp.tanh(
            jnp.dot(x.astype(jnp.bfloat16), w2_ref[...],
                    preferred_element_type=jnp.float32) + b2
        )
        # Fused mu|sigma head: one lane-dense [bm, head_pad] matmul.
        y = (jnp.dot(x.astype(jnp.bfloat16), wh_ref[...],
                     preferred_element_type=jnp.float32) + bh)

        # Compact outputs: only the real columns go back to HBM.
        # Columns [0, n_a) -> mu; columns [n_a, 2*n_a) -> sigma = exp(log_sigma).
        mu_ref[...] = y[:, 0:n_a]
        sigma_ref[...] = jnp.exp(y[:, n_a:2 * n_a])

    return kernel


def _choose_bm(batch):
    """Batch-tile rows.  Tiny batches: one small (sublane-aligned) tile.
    Large batches: a 128-row multiple up to 2048, aiming for >= 2-4 grid
    steps so the 'parallel' axis shards across v7x's two TensorCores."""
    if batch <= 128:
        return _round_up(max(batch, 8), 8)
    return min(2048, max(128, ((batch // 4) // 128) * 128))


def actor_forward(s, packed, *, n_a):
    """s: [B, N_S] float32. packed: dict from pack_actor_params.
    Returns (mu, sigma) float32 [B, N_A]."""
    B, n_s = s.shape
    hidden = packed["w1"].shape[1]        # padded hidden (128)
    head_pad = packed["wh"].shape[1]      # padded fused-head width (128)
    btot = packed["b_all"].shape[1]

    bm = _choose_bm(B)
    b_pad = pl.cdiv(B, bm) * bm
    if b_pad != B:
        s = jnp.pad(s, ((0, b_pad - B), (0, 0)))   # zero rows, sliced off after
    grid = (b_pad // bm,)

    kernel = _make_actor_kernel(n_a, hidden, head_pad)

    flops = 2 * b_pad * hidden * (n_s + hidden + head_pad)
    transcendentals = b_pad * (2 * hidden + n_a)
    bytes_accessed = (int(s.size) * 4
                      + int(packed["w1"].size) * 2
                      + int(packed["w2"].size) * 2
                      + int(packed["wh"].size) * 2
                      + int(packed["b_all"].size) * 4
                      + 2 * b_pad * n_a * 4)

    mu, sigma = pl.pallas_call(
        kernel,
        out_shape=(jax.ShapeDtypeStruct((b_pad, n_a), jnp.float32),
                   jax.ShapeDtypeStruct((b_pad, n_a), jnp.float32)),
        grid=grid,
        in_specs=[
            pl.BlockSpec((bm, n_s), lambda i: (i, 0)),
            pl.BlockSpec((n_s, hidden), lambda i: (0, 0)),
            pl.BlockSpec((hidden, hidden), lambda i: (0, 0)),
            pl.BlockSpec((hidden, head_pad), lambda i: (0, 0)),
            pl.BlockSpec((1, btot), lambda i: (0, 0)),
        ],
        out_specs=(pl.BlockSpec((bm, n_a), lambda i: (i, 0)),
                   pl.BlockSpec((bm, n_a), lambda i: (i, 0))),
        compiler_params=pltpu.CompilerParams(
            dimension_semantics=("parallel",),
            vmem_limit_bytes=32 * 1024 * 1024),
        cost_estimate=pl.CostEstimate(
            flops=flops,
            transcendentals=transcendentals,
            bytes_accessed=bytes_accessed),
    )(s, packed["w1"], packed["w2"], packed["wh"], packed["b_all"])

    if b_pad != B:
        mu = mu[:B]
        sigma = sigma[:B]
    return mu, sigma


def init_actor_params(key, n_s, n_a, hidden=64):
    """Deterministic synthetic init mimicking Actor.__init__ / set_init:
    weights ~ Normal(0, 0.1), biases = 0, mu weights additionally scaled by
    0.1, mu bias forced to 0. Weights stored as [in, out] (transposed vs
    nn.Linear). Kept in f32; pack_actor_params produces the kernel operands."""
    k1, k2, k3, k4 = jax.random.split(key, 4)
    std = 0.1
    return {
        "w1": std * jax.random.normal(k1, (n_s, hidden), jnp.float32),
        "b1": jnp.zeros((1, hidden), jnp.float32),
        "w2": std * jax.random.normal(k2, (hidden, hidden), jnp.float32),
        "b2": jnp.zeros((1, hidden), jnp.float32),
        "wsig": std * jax.random.normal(k3, (hidden, n_a), jnp.float32),
        "bsig": jnp.zeros((1, n_a), jnp.float32),
        # mu.weight.data.mul_(0.1); mu.bias.data.mul_(0.0)
        "wmu": 0.1 * (std * jax.random.normal(k4, (hidden, n_a), jnp.float32)),
        "bmu": jnp.zeros((1, n_a), jnp.float32),
    }


def pack_actor_params(p, n_a, hidden=64, hidden_pad=128):
    """One-time host-side packing:
      * hidden padded to 128 (lane-dense activations, full-width MXU K),
      * fused + padded mu|sigma head weight [hidden_pad, head_pad],
      * all biases concatenated into one f32 row with 128-aligned offsets,
      * matmul weights cast to bf16 (native MXU input format).
    Zero padding is numerically exact."""
    n_s = p["w1"].shape[0]
    head_pad = _round_up(2 * n_a, 128)

    w1 = jnp.zeros((n_s, hidden_pad), jnp.float32).at[:, :hidden].set(p["w1"])
    w2 = jnp.zeros((hidden_pad, hidden_pad), jnp.float32)
    w2 = w2.at[:hidden, :hidden].set(p["w2"])
    wh = jnp.zeros((hidden_pad, head_pad), jnp.float32)
    wh = wh.at[:hidden, :n_a].set(p["wmu"])
    wh = wh.at[:hidden, n_a:2 * n_a].set(p["wsig"])

    b_all = jnp.zeros((1, 2 * hidden_pad + head_pad), jnp.float32)
    b_all = b_all.at[:, 0:hidden].set(p["b1"])
    b_all = b_all.at[:, hidden_pad:hidden_pad + hidden].set(p["b2"])
    b_all = b_all.at[:, 2 * hidden_pad:2 * hidden_pad + n_a].set(p["bmu"])
    b_all = b_all.at[:, 2 * hidden_pad + n_a:2 * hidden_pad + 2 * n_a].set(p["bsig"])

    return {
        "w1": w1.astype(jnp.bfloat16),
        "w2": w2.astype(jnp.bfloat16),
        "wh": wh.astype(jnp.bfloat16),
        "b_all": b_all,
    }


def _reference_forward(s, p):
    x = jnp.tanh(s @ p["w1"] + p["b1"])
    x = jnp.tanh(x @ p["w2"] + p["b2"])
    mu = x @ p["wmu"] + p["bmu"]
    sigma = jnp.exp(x @ p["wsig"] + p["bsig"])
    return mu, sigma


# TODO(synk): choose_action's Normal(mu, sigma).sample() (RNG policy sampling)
# is left to jax.random outside the kernel; only the deterministic forward is fused.

if __name__ == "__main__":
    N_S, N_A, HIDDEN = 16, 4, 64

    key = jax.random.PRNGKey(0)
    k_in, k_par, k_big, k_odd = jax.random.split(key, 4)
    params = init_actor_params(k_par, N_S, N_A, HIDDEN)
    packed = pack_actor_params(params, N_A, HIDDEN)

    # --- small batch (single small tile) ---
    B = 8
    s = jax.random.normal(k_in, (B, N_S), jnp.float32)
    mu, sigma = actor_forward(s, packed, n_a=N_A)
    jax.block_until_ready((mu, sigma))
    mu_ref, sigma_ref = _reference_forward(s, params)
    assert mu.shape == (B, N_A) and sigma.shape == (B, N_A)
    # bf16 matmul inputs -> loosen tolerance vs. pure-f32 reference.
    assert jnp.allclose(mu, mu_ref, atol=2e-2, rtol=2e-2)
    assert jnp.allclose(sigma, sigma_ref, atol=2e-2, rtol=2e-2)

    # --- larger batch (>=2 grid steps, parallel axis) and a non-divisible
    #     batch (exercises the pad-to-tile path) ---
    for B2, k2 in ((256, k_big), (100, k_odd)):
        s2 = jax.random.normal(k2, (B2, N_S), jnp.float32)
        mu2, sigma2 = actor_forward(s2, packed, n_a=N_A)
        jax.block_until_ready((mu2, sigma2))
        mu2_ref, sigma2_ref = _reference_forward(s2, params)
        assert mu2.shape == (B2, N_A) and sigma2.shape == (B2, N_A)
        assert jnp.allclose(mu2, mu2_ref, atol=2e-2, rtol=2e-2)
        assert jnp.allclose(sigma2, sigma2_ref, atol=2e-2, rtol=2e-2)

    print("KERNEL_OK")
</pallas_src>

<mosaic_0001>
module attributes {stable_mosaic.version = 11 : i64} {
  func.func @kernel(%arg0: i32, %arg1: memref<8x16xf32, #tpu.memory_space<vmem>>, %arg2: memref<16x128xbf16, #tpu.memory_space<vmem>>, %arg3: memref<128x128xbf16, #tpu.memory_space<vmem>>, %arg4: memref<128x128xbf16, #tpu.memory_space<vmem>>, %arg5: memref<1x384xf32, #tpu.memory_space<vmem>>, %arg6: memref<8x4xf32, #tpu.memory_space<vmem>>, %arg7: memref<8x4xf32, #tpu.memory_space<vmem>>) attributes {dimension_semantics = [#tpu.dimension_semantics<parallel>], iteration_bounds = array<i64: 1>, scalar_prefetch = 0 : i64, scratch_operands = 0 : i64, tpu.core_type = #tpu.core_type<tc>, window_params = [{transform_indices = @transform_0, window_bounds = array<i64: 8, 16>}, {pipeline_mode = #tpu.pipeline_mode<synchronous>, transform_indices = @transform_1, window_bounds = array<i64: 16, 128>}, {pipeline_mode = #tpu.pipeline_mode<synchronous>, transform_indices = @transform_2, window_bounds = array<i64: 128, 128>}, {pipeline_mode = #tpu.pipeline_mode<synchronous>, transform_indices = @transform_3, window_bounds = array<i64: 128, 128>}, {pipeline_mode = #tpu.pipeline_mode<synchronous>, transform_indices = @transform_4, window_bounds = array<i64: 1, 384>}, {transform_indices = @transform_5, window_bounds = array<i64: 8, 4>}, {transform_indices = @transform_6, window_bounds = array<i64: 8, 4>}]} {
    %c0 = arith.constant 0 : index
    %c0_0 = arith.constant 0 : index
    %0 = vector.load %arg5[%c0, %c0_0] : memref<1x384xf32, #tpu.memory_space<vmem>>, vector<1x128xf32>
    %c0_1 = arith.constant 0 : index
    %c128 = arith.constant 128 : index
    %1 = vector.load %arg5[%c0_1, %c128] : memref<1x384xf32, #tpu.memory_space<vmem>>, vector<1x128xf32>
    %c0_2 = arith.constant 0 : index
    %c256 = arith.constant 256 : index
    %2 = vector.load %arg5[%c0_2, %c256] : memref<1x384xf32, #tpu.memory_space<vmem>>, vector<1x128xf32>
    %c0_3 = arith.constant 0 : index
    %c0_4 = arith.constant 0 : index
    %3 = vector.load %arg1[%c0_3, %c0_4] : memref<8x16xf32, #tpu.memory_space<vmem>>, vector<8x16xf32>
    %4 = arith.truncf %3 : vector<8x16xf32> to vector<8x16xbf16>
    %c0_5 = arith.constant 0 : index
    %c0_6 = arith.constant 0 : index
    %5 = vector.load %arg2[%c0_5, %c0_6] : memref<16x128xbf16, #tpu.memory_space<vmem>>, vector<16x128xbf16>
    %cst = arith.constant dense<0.000000e+00> : vector<8x128xf32>
    %6 = tpu.matmul %4, %5, %cst {dimension_numbers = #tpu.dot_dimension_numbers<[1], [0], [0], [1], [0, 0, 1, 1], [], []>} : vector<8x16xbf16>, vector<16x128xbf16>, vector<8x128xf32> -> vector<8x128xf32>
    %7 = vector.broadcast %0 : vector<1x128xf32> to vector<8x128xf32>
    %8 = arith.addf %6, %7 : vector<8x128xf32>
    %9 = math.tanh %8 : vector<8x128xf32>
    %10 = arith.truncf %9 : vector<8x128xf32> to vector<8x128xbf16>
    %c0_7 = arith.constant 0 : index
    %c0_8 = arith.constant 0 : index
    %11 = vector.load %arg3[%c0_7, %c0_8] : memref<128x128xbf16, #tpu.memory_space<vmem>>, vector<128x128xbf16>
    %cst_9 = arith.constant dense<0.000000e+00> : vector<8x128xf32>
    %12 = tpu.matmul %10, %11, %cst_9 {dimension_numbers = #tpu.dot_dimension_numbers<[1], [0], [0], [1], [0, 0, 1, 1], [], []>} : vector<8x128xbf16>, vector<128x128xbf16>, vector<8x128xf32> -> vector<8x128xf32>
    %13 = vector.broadcast %1 : vector<1x128xf32> to vector<8x128xf32>
    %14 = arith.addf %12, %13 : vector<8x128xf32>
    %15 = math.tanh %14 : vector<8x128xf32>
    %16 = arith.truncf %15 : vector<8x128xf32> to vector<8x128xbf16>
    %c0_10 = arith.constant 0 : index
    %c0_11 = arith.constant 0 : index
    %17 = vector.load %arg4[%c0_10, %c0_11] : memref<128x128xbf16, #tpu.memory_space<vmem>>, vector<128x128xbf16>
    %cst_12 = arith.constant dense<0.000000e+00> : vector<8x128xf32>
    %18 = tpu.matmul %16, %17, %cst_12 {dimension_numbers = #tpu.dot_dimension_numbers<[1], [0], [0], [1], [0, 0, 1, 1], [], []>} : vector<8x128xbf16>, vector<128x128xbf16>, vector<8x128xf32> -> vector<8x128xf32>
    %19 = vector.broadcast %2 : vector<1x128xf32> to vector<8x128xf32>
    %20 = arith.addf %18, %19 : vector<8x128xf32>
    %21 = vector.extract_strided_slice %20 {offsets = [0, 0], sizes = [8, 4], strides = [1, 1]} : vector<8x128xf32> to vector<8x4xf32>
    %c0_13 = arith.constant 0 : index
    %c0_14 = arith.constant 0 : index
    %22 = vector.load %arg6[%c0_13, %c0_14] : memref<8x4xf32, #tpu.memory_space<vmem>>, vector<8x4xf32>
    tpu.vector_store %arg6[%c0_13, %c0_14], %21 {strides = array<i32>} : memref<8x4xf32, #tpu.memory_space<vmem>>, vector<8x4xf32>,
    %23 = vector.extract_strided_slice %20 {offsets = [0, 4], sizes = [8, 4], strides = [1, 1]} : vector<8x128xf32> to vector<8x4xf32>
    %24 = math.exp %23 : vector<8x4xf32>
    %c0_15 = arith.constant 0 : index
    %c0_16 = arith.constant 0 : index
    %25 = vector.load %arg7[%c0_15, %c0_16] : memref<8x4xf32, #tpu.memory_space<vmem>>, vector<8x4xf32>
    tpu.vector_store %arg7[%c0_15, %c0_16], %24 {strides = array<i32>} : memref<8x4xf32, #tpu.memory_space<vmem>>, vector<8x4xf32>,
    return
  }
  func.func @transform_0(%arg0: i32) -> (i32, i32) {
    %c0_i32 = arith.constant 0 : i32
    %c0_i32_0 = arith.constant 0 : i32
    return %arg0, %c0_i32 : i32, i32
  }
  func.func @transform_1(%arg0: i32) -> (i32, i32) {
    %c0_i32 = arith.constant 0 : i32
    %c0_i32_0 = arith.constant 0 : i32
    %c0_i32_1 = arith.constant 0 : i32
    return %c0_i32, %c0_i32_0 : i32, i32
  }
  func.func @transform_2(%arg0: i32) -> (i32, i32) {
    %c0_i32 = arith.constant 0 : i32
    %c0_i32_0 = arith.constant 0 : i32
    %c0_i32_1 = arith.constant 0 : i32
    return %c0_i32, %c0_i32_0 : i32, i32
  }
  func.func @transform_3(%arg0: i32) -> (i32, i32) {
    %c0_i32 = arith.constant 0 : i32
    %c0_i32_0 = arith.constant 0 : i32
    %c0_i32_1 = arith.constant 0 : i32
    return %c0_i32, %c0_i32_0 : i32, i32
  }
  func.func @transform_4(%arg0: i32) -> (i32, i32) {
    %c0_i32 = arith.constant 0 : i32
    %c0_i32_0 = arith.constant 0 : i32
    %c0_i32_1 = arith.constant 0 : i32
    return %c0_i32, %c0_i32_0 : i32, i32
  }
  func.func @transform_5(%arg0: i32) -> (i32, i32) {
    %c0_i32 = arith.constant 0 : i32
    %c0_i32_0 = arith.constant 0 : i32
    return %arg0, %c0_i32 : i32, i32
  }
  func.func @transform_6(%arg0: i32) -> (i32, i32) {
    %c0_i32 = arith.constant 0 : i32
    %c0_i32_0 = arith.constant 0 : i32
    return %arg0, %c0_i32 : i32, i32
  }
}

</mosaic_0001>

<bundles_post_ra>
// kernel: tpu_custom_call.1
= control target key start
LH: loop header
LB: loop body
LE: loop exit
PB: predicated region body
PF: predicated region fallthrough
CT: control target
= control target key end

     0   :  { %12 = vsyncpa [#allocation3], 0  ;;  %s735_s0 = inlined_call_operand.hbm [shape: f32[8,16], index: 0, kind: input, shape index: {}]   ;;  %s736_s1 = inlined_call_operand.hbm [shape: bf16[16,128], index: 1, kind: input, shape index: {}]   ;;  %s737_s2 = inlined_call_operand.hbm [shape: bf16[128,128], index: 2, kind: input, shape index: {}]   ;;  %s738_s3 = inlined_call_operand.hbm [shape: bf16[128,128], index: 3, kind: input, shape index: {}]   ;;  %s739_s4 = inlined_call_operand.vmem [shape: f32[1,384], index: 4, kind: input, shape index: {}]   ;;  %s740_s5 = inlined_call_operand.vmem [shape: f32[8,4], index: 5, kind: output, shape index: {0}]   ;;  %s741_s6 = inlined_call_operand.vmem [shape: f32[8,4], index: 6, kind: output, shape index: {1}]  }
   0x1   :  { %13 = vsyncpa [#allocation5], 0 }
   0x2   :  { %14 = vsyncpa [#allocation8], 0  ;;  %s596_s21 = smov [#allocation4]   ;;  %s502_s25 = scalar_lea.hbm %s736_s1, 128 }
   0x3   :  { %s30_s22 = sshll.u32 %s596_s21, 4  ;;  %p503_p0 = scmp.ne.s32.totalorder %s736_s1, %s502_s25  ;;  %s31_s22 = int_to_ptr.vmem [resolvable:$true] %s30_s22 }
   0x4   :  { %p506_p1 = scmp.lt.u32.totalorder %s502_s25, %s736_s1 }
   0x6   :  { %p508_p2 = pnand %p506_p1, %p503_p0 }
   0x8   :  { %511 = shalt.err (!%p508_p2)
}
   0x9   :  { %s512_s30 = scalar_lea.vmem %s31_s22, 128  ;;  %p517_p4 = scmp.lt.s32.totalorder %s31_s22, %s31_s22 }
   0xa   :  { %p513_p3 = scmp.ne.s32.totalorder %s31_s22, %s512_s30  ;;  %p518_p5 = scmp.lt.s32.totalorder %s512_s30, %s512_s30 }
   0xc   :  { %p519_p6 = por %p518_p5, %p517_p4 }
   0xe   :  { %p520_p7 = pnand %p519_p6, %p513_p3 }
  0x10   :  { %523 = shalt.err (!%p520_p7)
}
  0x11   :  { %s597_s7 = smov 64   ;;  %s598_s8 = smov 4  }
  0x12   :  { %36 = dma.hbm_to_vmem [thread:$0]  %s736_s1, 128, %s31_s22, [#allocation5], %s597_s7, %s597_s7, %s598_s8  }
  0x13   :  { %s599_s11 = smov [#allocation2]   ;;  %s600_s13 = smov [#allocation6]  }
  0x14   :  { %s21_s12 = sshll.u32 %s599_s11, 4  ;;  %s42_s14 = sshll.u32 %s600_s13, 4  ;;  %s22_s12 = int_to_ptr.vmem [resolvable:$true] %s21_s12  ;;  %s43_s14 = int_to_ptr.vmem [resolvable:$true] %s42_s14 }
  0x15   :  { %s524_s17 = scalar_lea.hbm %s735_s0, 128 }
  0x16   :  { %p525_p8 = scmp.ne.s32.totalorder %s735_s0, %s524_s17  ;;  %p528_p9 = scmp.lt.u32.totalorder %s524_s17, %s735_s0 }
  0x18   :  { %p530_p10 = pnand %p528_p9, %p525_p8 }
  0x1a   :  { %533 = shalt.err (!%p530_p10)
}
  0x1b   :  { %s534_s1 = scalar_lea.vmem %s22_s12, 128  ;;  %p539_p12 = scmp.lt.s32.totalorder %s22_s12, %s22_s12 }
  0x1c   :  { %p535_p11 = scmp.ne.s32.totalorder %s22_s12, %s534_s1  ;;  %p540_p13 = scmp.lt.s32.totalorder %s534_s1, %s534_s1 }
  0x1e   :  { %p541_p0 = por %p540_p13, %p539_p12 }
  0x20   :  { %p542_p1 = pnand %p541_p0, %p535_p11 }
  0x22   :  { %545 = shalt.err (!%p542_p1)
}
  0x23   :  { %24 = dma.hbm_to_vmem [thread:$0]  %s735_s0, 128, %s22_s12, [#allocation3]  }
  0x24   :  { %s546_s26 = scalar_lea.hbm %s737_s2, 1024 }
  0x25   :  { %p547_p2 = scmp.ne.s32.totalorder %s737_s2, %s546_s26  ;;  %p550_p3 = scmp.lt.u32.totalorder %s546_s26, %s737_s2 }
  0x27   :  { %p552_p4 = pnand %p550_p3, %p547_p2 }
  0x29   :  { %555 = shalt.err (!%p552_p4)
}
  0x2a   :  { %s556_s9 = scalar_lea.vmem %s43_s14, 1024  ;;  %p561_p6 = scmp.lt.s32.totalorder %s43_s14, %s43_s14 }
  0x2b   :  { %p557_p5 = scmp.ne.s32.totalorder %s43_s14, %s556_s9  ;;  %p562_p7 = scmp.lt.s32.totalorder %s556_s9, %s556_s9 }
  0x2d   :  { %p563_p8 = por %p562_p7, %p561_p6 }
  0x2f   :  { %p564_p9 = pnand %p563_p8, %p557_p5 }
  0x31   :  { %567 = shalt.err (!%p564_p9)
}
  0x32   :  { %48 = dma.hbm_to_vmem [thread:$0]  %s737_s2, 1024, %s43_s14, [#allocation5], %s597_s7, %s597_s7, %s598_s8  }
  0x33   :  { %s601_s11 = smov [#allocation7]   ;;  %s568_s16 = scalar_lea.hbm %s738_s3, 1024 }
  0x34   :  { %s54_s12 = sshll.u32 %s601_s11, 4  ;;  %p569_p10 = scmp.ne.s32.totalorder %s738_s3, %s568_s16  ;;  %s55_s12 = int_to_ptr.vmem [resolvable:$true] %s54_s12 }
  0x35   :  { %p572_p11 = scmp.lt.u32.totalorder %s568_s16, %s738_s3 }
  0x37   :  { %p574_p12 = pnand %p572_p11, %p569_p10 }
  0x39   :  { %577 = shalt.err (!%p574_p12)
}
  0x3a   :  { %s578_s21 = scalar_lea.vmem %s55_s12, 1024  ;;  %p583_p0 = scmp.lt.s32.totalorder %s55_s12, %s55_s12 }
  0x3b   :  { %p579_p13 = scmp.ne.s32.totalorder %s55_s12, %s578_s21  ;;  %p584_p1 = scmp.lt.s32.totalorder %s578_s21, %s578_s21 }
  0x3d   :  { %p585_p2 = por %p584_p1, %p583_p0 }
  0x3f   :  { %p586_p3 = pnand %p585_p2, %p579_p13 }
  0x41   :  { %589 = shalt.err (!%p586_p3)
}
  0x42   :  { %60 = dma.hbm_to_vmem [thread:$0]  %s738_s3, 1024, %s55_s12, [#allocation8], %s597_s7, %s597_s7, %s598_s8  }
  0x43   :  { %590 = dma.done.wait [#allocation3], 128  }
  0x44   :  { %591 = vsyncadd [#allocation3], 4294967168 }
  0x45   :  { %592 = dma.done.wait [#allocation5], 1152  }
  0x46   :  { %593 = vsyncadd [#allocation5], 4294966144 }
  0x47   :  { %594 = dma.done.wait [#allocation8], 1024  }
  0x48   :  { %595 = vsyncadd [#allocation8], 4294966272  ;;  %v602_v0 = vmov 0.0   ;;  %vm603_vm0 = vmmov 0   ;;  %v479_v1 = vld [vmem:[#allocation4] sm:$0xff]   ;;  %v79_v2 = vld [vmem:[#allocation2] sm:$0xff] }
  0x49   :  { %424 = vmatprep.subr.bf16.mxu0 %v602_v0  ;;  %426 = vmatprep.mubr.msk.bf16.mxu0 %vm603_vm0, %v602_v0  ;;  %v80_v3 = vpack.c.bf16 %v79_v2, %v79_v2  ;;  %vm95_vm1 = vcmask 130048   ;;  %v480_v4 = vld [vmem:[#allocation6] sm:$0xff]   ;;  %v481_v5 = vld [vmem:[#allocation6 + $0x8] sm:$0xff]   ;;  %v482_v6 = vld [vmem:[#allocation6 + $0x10] sm:$0xff]   ;;  %vm363_vm2 = vcmask 31744   ;;  %s604_s26 = smov 124  }
  0x4a   :  { %430 = vmatprep.subr.bf16.mxu1 %v602_v0  ;;  %446 = vmatprep.mubr.msk.bf16.mxu1 %vm603_vm0, %v602_v0  ;;  %v483_v7 = vld [vmem:[#allocation6 + $0x18] sm:$0xff]   ;;  %v484_v8 = vld [vmem:[#allocation6 + $0x20] sm:$0xff]   ;;  %v485_v9 = vld [vmem:[#allocation6 + $0x28] sm:$0xff]  }
  0x4b   :  { %425 = vmatpush3.bf16.msra.mxu0 %v479_v1  ;;  %431 = vmatpush3.bf16.msra.mxu1 %v480_v4  ;;  %v486_v10 = vld [vmem:[#allocation6 + $0x30] sm:$0xff]   ;;  %v487_v11 = vld [vmem:[#allocation6 + $0x38] sm:$0xff]   ;;  %v488_v12 = vld [vmem:[#allocation7] sm:$0xff]  }
  0x4c   :  { %450 = vmatprep.subr.bf16.mxu0 %v602_v0  ;;  %432 = vmatprep.subr.bf16.mxu1 %v602_v0  ;;  %v489_v13 = vld [vmem:[#allocation7 + $0x8] sm:$0xff]   ;;  %v490_v14 = vld [vmem:[#allocation7 + $0x10] sm:$0xff]   ;;  %v491_v15 = vld [vmem:[#allocation7 + $0x18] sm:$0xff]  }
  0x4d   :  { %v383_v16 = vld [vmem:[%s739_s4] ss:$0 sm:$0xff]  ;;  %v492_v24 = vld [vmem:[#allocation7 + $0x20] sm:$0xff]   ;;  %v493_v25 = vld [vmem:[#allocation7 + $0x28] sm:$0xff]  }
  0x4e   :  { %427 = vmatmul.mubr.msk.bf16.vlgmr.msra.gmra.mrb[0].mxu0 %vm95_vm1, %v80_v3  ;;  %v494_v26 = vld [vmem:[#allocation7 + $0x30] sm:$0xff]   ;;  %v495_v27 = vld [vmem:[#allocation7 + $0x38] sm:$0xff]  }
  0x4f   :  { %466 = vmatprep.mubr.msk.bf16.mxu0 %vm603_vm0, %v602_v0  ;;  %433 = vmatpush3.bf16.msra.mxu1 %v481_v5  ;;  %v386_v28 = vld [vmem:[%s739_s4 + $0x1] ss:$0 sm:$0xff]  ;;  %v395_v36 = vld [vmem:[%s739_s4 + $0x2] ss:$0 sm:$0xff] }
  0x50   :  { %434 = vmatprep.subr.bf16.mxu1 %v602_v0  ;;  %451 = vmatpush3.bf16.msra.mxu0 %v488_v12 }
  0x51   :  { %452 = vmatprep.subr.bf16.mxu0 %v602_v0 }
  0x53   :  { %435 = vmatpush3.bf16.msra.mxu1 %v482_v6 }
  0x54   :  { %436 = vmatprep.subr.bf16.mxu1 %v602_v0  ;;  %453 = vmatpush3.bf16.msra.mxu0 %v489_v13 }
  0x55   :  { %454 = vmatprep.subr.bf16.mxu0 %v602_v0 }
  0x57   :  { %437 = vmatpush3.bf16.msra.mxu1 %v483_v7 }
  0x58   :  { %438 = vmatprep.subr.bf16.mxu1 %v602_v0  ;;  %455 = vmatpush3.bf16.msra.mxu0 %v490_v14 }
  0x59   :  { %456 = vmatprep.subr.bf16.mxu0 %v602_v0 }
  0x5b   :  { %439 = vmatpush3.bf16.msra.mxu1 %v484_v8 }
  0x5c   :  { %440 = vmatprep.subr.bf16.mxu1 %v602_v0  ;;  %457 = vmatpush3.bf16.msra.mxu0 %v491_v15 }
  0x5d   :  { %458 = vmatprep.subr.bf16.mxu0 %v602_v0 }
  0x5f   :  { %441 = vmatpush3.bf16.msra.mxu1 %v485_v9 }
  0x60   :  { %442 = vmatprep.subr.bf16.mxu1 %v602_v0  ;;  %459 = vmatpush3.bf16.msra.mxu0 %v492_v24 }
  0x61   :  { %460 = vmatprep.subr.bf16.mxu0 %v602_v0 }
  0x63   :  { %443 = vmatpush3.bf16.msra.mxu1 %v486_v10 }
  0x64   :  { %444 = vmatprep.subr.bf16.mxu1 %v602_v0  ;;  %461 = vmatpush3.bf16.msra.mxu0 %v493_v25 }
  0x65   :  { %462 = vmatprep.subr.bf16.mxu0 %v602_v0 }
  0x67   :  { %445 = vmatpush3.bf16.msra.mxu1 %v487_v11 }
  0x68   :  { %463 = vmatpush3.bf16.msra.mxu0 %v494_v26 }
  0x69   :  { %464 = vmatprep.subr.bf16.mxu0 %v602_v0 }
  0x6c   :  { %465 = vmatpush3.bf16.msra.mxu0 %v495_v27 }
 0x121   :  { %v133_v17 = vpop.f32.mrb[0].mxu0 }
 0x122   :  { %v134_v18 = vadd.f32 %v383_v16, %v133_v17  ;;  %v428_v19 = vpop.f32.mrb[1].mxu0 }
 0x123   :  { %v136_v20 = vpop.f32.mrb[2].mxu0 }
 0x124   :  { %496 = vtanh.f32 %v134_v18  ;;  %v429_v21 = vpop.f32.mrb[3].mxu0 }
 0x12e   :  { %v497_v22 = vpop.eup %496 }
 0x12f   :  { %v140_v23 = vpack.c.bf16 %v497_v22, %v497_v22 }
 0x131   :  { %447 = vmatmul.mubr.bf16.vlgmr.msra.gmra.mrb[0].mxu1 %v140_v23 }
 0x204   :  { %v245_v29 = vpop.f32.mrb[0].mxu1 }
 0x205   :  { %v246_v30 = vadd.f32 %v386_v28, %v245_v29  ;;  %v448_v31 = vpop.f32.mrb[1].mxu1 }
 0x206   :  { %v248_v32 = vpop.f32.mrb[2].mxu1 }
 0x207   :  { %498 = vtanh.f32 %v246_v30  ;;  %v449_v33 = vpop.f32.mrb[3].mxu1 }
 0x211   :  { %v499_v34 = vpop.eup %498 }
 0x212   :  { %v252_v35 = vpack.c.bf16 %v499_v34, %v499_v34 }
 0x214   :  { %467 = vmatmul.mubr.bf16.vlgmr.msra.gmra.mrb[4].mxu0 %v252_v35 }
 0x2e7   :  { %v357_v37 = vpop.f32.mrb[4].mxu0 }
 0x2e8   :  { %v358_v38 = vadd.f32 %v395_v36, %v357_v37  ;;  %v468_v39 = vpop.f32.mrb[5].mxu0 }
 0x2e9   :  { %v360_v40 = vpop.f32.mrb[6].mxu0 }
 0x2ea   :  { %v365_v41 = vmul.f32 1.442695, %v358_v38  ;;  %v469_v42 = vpop.f32.mrb[7].mxu0  ;;  %364 = vst.msk [vmem:[%s740_s5] sm:$0xff] %vm363_vm2, %v358_v38 }
 0x2ec   :  { %500 = vpow2.f32 %v365_v41 }
 0x2f6   :  { %v501_v43 = vpop.eup %500 }
 0x2f7   :  { %368 = vrot.lane.b32.xlu0 %v501_v43, %s604_s26 }
 0x369   :  { %v369_v44 = vpop.permute.xlu0 %368 }
 0x36a   :  { %371 = vst.msk [vmem:[%s741_s6] sm:$0xff] %vm363_vm2, %v369_v44 }
 0x36b   :  { %380 = vsyncpa [#allocation3], 1 }
 0x36c   :  { %381 = vsyncpa [#allocation5], 1 }
 0x36d   :  { %382 = vsyncpa [#allocation8], 1 }

</bundles_post_ra>
